<compile_context>
chip_gen: v7x
topology: tpu7x:2x2x1
jax: 0.10.0
libtpu: 0.0.40
codegen_flags: <defaults>
</compile_context>

<pallas_src>
import functools
import math

import jax
import jax.numpy as jnp
from jax.experimental import pallas as pl
from jax.experimental.pallas import tpu as pltpu

EPS = 1e-7
LOG_EPS = math.log(EPS)  # ~ -16.118


def _focal_loss_kernel(logits_ref, target_ref, out_ref, acc_ref, *,
                       beta, gamma, n_rows, block_rows, blocks_per_chunk,
                       need_mask):
    i = pl.program_id(1)  # reduction axis (row blocks within this chunk)

    @pl.when(i == 0)
    def _():
        acc_ref[...] = jnp.zeros_like(acc_ref)

    x = logits_ref[...].astype(jnp.float32)
    t = target_ref[...].astype(jnp.float32)

    # Stable softplus: sp = log(1 + exp(x)).  Then
    #   log(sigmoid(x))     = x - sp
    #   log(1 - sigmoid(x)) = -sp
    # 3 EUP ops/elem (exp, log1p, and the exp(log_probs) below) instead of
    # sigmoid + two logs.  Floor at log(EPS) reproduces the original "+EPS".
    sp = jnp.maximum(x, 0.0) + jnp.log1p(jnp.exp(-jnp.abs(x)))
    lp_pos = jnp.maximum(x - sp, LOG_EPS)   # ~= log(sigmoid(x) + EPS)
    lp_neg = jnp.maximum(-sp, LOG_EPS)      # ~= log(1 - sigmoid(x) + EPS)

    log_probs = t * lp_pos + beta * (1.0 - t) * lp_neg
    focal = 1.0 - jnp.exp(log_probs)

    # gamma specialisation: float-exponent pow lowers to log+exp on the
    # single-slot EUP; integer gammas use exponentiation-by-squaring (VALU).
    g = float(gamma)
    if g == 0.0:
        w = jnp.ones_like(focal)
    elif g == 1.0:
        w = focal
    elif g.is_integer() and 2.0 <= g <= 64.0:
        e, b, w = int(g), focal, None
        while e:
            if e & 1:
                w = b if w is None else w * b
            e >>= 1
            if e:
                b = b * b
    else:
        w = focal ** g  # general non-integer gamma

    loss = -w * log_probs

    if need_mask:
        # cdiv tail / core-split padding block: zero rows past the true N
        # (jnp.where also discards any garbage from the padded DMA region).
        blk = pl.program_id(0) * blocks_per_chunk + i
        row = blk * block_rows + jax.lax.broadcasted_iota(
            jnp.int32, loss.shape, 0)
        loss = jnp.where(row < n_rows, loss, jnp.zeros_like(loss))

    # Fold the (block_rows, C) tile into the small (8, C) accumulator using
    # static 8-row (sublane-tile) slices: pure VPU adds, no XLU, no per-step
    # full-tile accumulator traffic.
    folded = loss[0:8, :]
    for gidx in range(1, block_rows // 8):
        folded = folded + loss[8 * gidx:8 * (gidx + 1), :]
    acc_ref[...] += folded

    @pl.when(i == pl.num_programs(1) - 1)
    def _():
        # Single cross-sublane reduce per chunk, epilogue only.
        col = jnp.sum(acc_ref[...], axis=0, keepdims=True)    # (1, C)
        out_ref[...] = col.reshape(1, 1, col.shape[-1])        # (1, 1, C)


def _round_up(v, m):
    return ((v + m - 1) // m) * m


def _vmem_capacity_bytes():
    try:
        cap = int(getattr(pltpu.get_tpu_info(), "vmem_capacity_bytes"))
        if cap > 0:
            return cap
    except Exception:
        pass
    return 64 * 1024 * 1024  # conservative: smallest current-gen per-core VMEM


def focal_loss_selective(logits, target, *, beta=0.5, gamma=1.0,
                         block_rows=None, target_block_bytes=None):
    """Mean focal selective loss over all elements of (N, C) logits/target."""
    assert logits.shape == target.shape and logits.ndim == 2
    N, C = logits.shape

    it_l = jnp.dtype(logits.dtype).itemsize
    it_t = jnp.dtype(target.dtype).itemsize
    in_row_bytes = C * (it_l + it_t)

    vmem_cap = _vmem_capacity_bytes()
    # Generation-aware scoped-VMEM ceiling (~45% of per-core VMEM, <= 64 MiB):
    # ~28 MiB on v7x (64 MiB/TC), ~57 MiB on v5e/v6e (128 MiB).
    vmem_ceiling = max(16 * 1024 * 1024,
                       min(int(vmem_cap * 0.45), 64 * 1024 * 1024))

    # Sub-32-bit dtypes pack along sublanes: 16-row align for bf16, 32 for i8.
    row_align = 8 * max(1, 4 // max(1, min(it_l, it_t)))

    if block_rows is None:
        if target_block_bytes is None:
            target_block_bytes = max(1 << 20, min(8 << 20, vmem_cap // 12))
        block_rows = target_block_bytes // max(1, C * max(it_l, it_t))
        block_rows = max(row_align, (block_rows // row_align) * row_align)
    block_rows = max(8, _round_up(int(block_rows), 8))
    # No point tiling past the (8-aligned) array extent; cap bounds the
    # statically-unrolled accumulator fold to <= 128 adds.
    block_rows = min(block_rows, _round_up(N, 8), 1024)

    num_blocks = pl.cdiv(N, block_rows)
    # Leading "parallel" axis (2 chunks) lets megacore chips shard the row
    # blocks across TensorCores; it is a harmless serial loop on 1-TC chips.
    num_chunks = 2 if num_blocks >= 2 else 1
    blocks_per_chunk = pl.cdiv(num_blocks, num_chunks)
    padded_blocks = num_chunks * blocks_per_chunk
    need_mask = padded_blocks * block_rows > N

    kernel = functools.partial(
        _focal_loss_kernel, beta=float(beta), gamma=float(gamma),
        n_rows=N, block_rows=block_rows, blocks_per_chunk=blocks_per_chunk,
        need_mask=need_mask)

    # VMEM budget: 2 inputs x 2 pipeline buffers x tile + (8,C) f32 acc + out.
    need = 2 * block_rows * in_row_bytes + 8 * C * 4 + 2 * num_chunks * C * 4
    vmem_limit = int(min(vmem_ceiling,
                         max(16 * 1024 * 1024, need + need // 2)))

    in_bytes = logits.size * it_l + target.size * it_t
    cost = pl.CostEstimate(flops=16 * N * C,
                           transcendentals=3 * N * C,
                           bytes_accessed=in_bytes + num_chunks * C * 4)

    last_blk = num_blocks - 1
    if padded_blocks == num_blocks:
        in_map = lambda c, i: (c * blocks_per_chunk + i, 0)
    else:
        # Keep the DMA window in-bounds for the padding block; its rows are
        # zeroed by the in-kernel row mask.
        in_map = lambda c, i: (jnp.minimum(c * blocks_per_chunk + i,
                                           last_blk), 0)

    partials = pl.pallas_call(
        kernel,
        out_shape=jax.ShapeDtypeStruct((num_chunks, 1, C), jnp.float32),
        grid_spec=pltpu.PrefetchScalarGridSpec(
            num_scalar_prefetch=0,
            grid=(num_chunks, blocks_per_chunk),
            in_specs=[
                pl.BlockSpec((block_rows, C), in_map),
                pl.BlockSpec((block_rows, C), in_map),
            ],
            out_specs=pl.BlockSpec((1, 1, C), lambda c, i: (c, 0, 0)),
            scratch_shapes=[pltpu.VMEM((8, C), jnp.float32)],
        ),
        compiler_params=pltpu.CompilerParams(
            dimension_semantics=("parallel", "arbitrary"),
            vmem_limit_bytes=vmem_limit),
        cost_estimate=cost,
    )(logits, target)

    return jnp.sum(partials) / jnp.float32(N * C)


def _reference(logits, target, *, beta=0.5, gamma=1.0):
    x = logits.astype(jnp.float32)
    t = target.astype(jnp.float32)
    sig = jax.nn.sigmoid(x)
    lp = (t * jnp.maximum(jnp.log(sig + EPS), -100.0)
          + beta * (1.0 - t) * jnp.maximum(jnp.log(1.0 - sig + EPS), -100.0))
    loss = -1.0 * (1.0 - jnp.exp(lp)) ** gamma * lp
    return loss.mean()


if __name__ == "__main__":
    key = jax.random.PRNGKey(0)

    configs = [
        # (N, C, dtype, block_rows, beta, gamma)
        (64, 256, jnp.float32, None, 0.5, 1.0),   # auto tiling, single block
        (64, 256, jnp.bfloat16, 16, 0.25, 2.0),   # bf16 inputs, 2x2 grid
        (48, 200, jnp.float32, 8, 0.7, 3.0),      # non-128-multiple C, 2x3 grid
        (40, 256, jnp.float32, 16, 0.5, 4.0),     # cdiv tail + padding block
    ]

    for idx, (N, C, dt, br, beta, gamma) in enumerate(configs):
        k1, k2 = jax.random.split(jax.random.fold_in(key, idx))
        logits = (jax.random.normal(k1, (N, C), dtype=jnp.float32) * 2.0).astype(dt)
        target = (jax.random.uniform(k2, (N, C)) > 0.5).astype(dt)

        out = focal_loss_selective(logits, target, beta=beta, gamma=gamma,
                                   block_rows=br)
        out = jax.block_until_ready(out)

        ref = _reference(logits, target, beta=beta, gamma=gamma)
        assert jnp.allclose(out, ref, rtol=1e-5, atol=1e-6), (idx, out, ref)

    print("KERNEL_OK")
</pallas_src>

<mosaic_0001>
module attributes {stable_mosaic.version = 11 : i64} {
  func.func @_focal_loss_kernel(%arg0: i32, %arg1: i32, %arg2: memref<64x256xf32, #tpu.memory_space<vmem>>, %arg3: memref<64x256xf32, #tpu.memory_space<vmem>>, %arg4: memref<1x1x256xf32, #tpu.memory_space<vmem>>, %arg5: memref<8x256xf32, #tpu.memory_space<vmem>>) attributes {dimension_semantics = [#tpu.dimension_semantics<parallel>, #tpu.dimension_semantics<arbitrary>], iteration_bounds = array<i64: 1, 1>, scalar_prefetch = 0 : i64, scratch_operands = 1 : i64, tpu.core_type = #tpu.core_type<tc>, window_params = [{transform_indices = @transform_0, window_bounds = array<i64: 64, 256>}, {transform_indices = @transform_1, window_bounds = array<i64: 64, 256>}, {transform_indices = @transform_2, window_bounds = array<i64: 1, 1, 256>}]} {
    %c0_i32 = arith.constant 0 : i32
    %0 = arith.cmpi eq, %arg1, %c0_i32 : i32
    %1 = arith.extui %0 : i1 to i32
    %c0_i32_0 = arith.constant 0 : i32
    %2 = arith.cmpi ne, %1, %c0_i32_0 : i32
    scf.if %2 {
      %cst_18 = arith.constant 0.000000e+00 : f32
      %54 = vector.broadcast %cst_18 : f32 to vector<8x256xf32>
      %c0_19 = arith.constant 0 : index
      %c0_20 = arith.constant 0 : index
      %55 = vector.load %arg5[%c0_19, %c0_20] : memref<8x256xf32, #tpu.memory_space<vmem>>, vector<8x256xf32>
      tpu.vector_store %arg5[%c0_19, %c0_20], %54 {strides = array<i32>} : memref<8x256xf32, #tpu.memory_space<vmem>>, vector<8x256xf32>,
    } else {
    }
    %c0 = arith.constant 0 : index
    %c0_1 = arith.constant 0 : index
    %3 = vector.load %arg2[%c0, %c0_1] : memref<64x256xf32, #tpu.memory_space<vmem>>, vector<64x256xf32>
    %c0_2 = arith.constant 0 : index
    %c0_3 = arith.constant 0 : index
    %4 = vector.load %arg3[%c0_2, %c0_3] : memref<64x256xf32, #tpu.memory_space<vmem>>, vector<64x256xf32>
    %cst = arith.constant 0.000000e+00 : f32
    %5 = vector.broadcast %cst : f32 to vector<64x256xf32>
    %6 = arith.maximumf %3, %5 : vector<64x256xf32>
    %7 = math.absf %3 : vector<64x256xf32>
    %cst_4 = arith.constant 0.000000e+00 : f32
    %8 = vector.broadcast %cst_4 : f32 to vector<64x256xf32>
    %9 = arith.subf %8, %7 : vector<64x256xf32>
    %10 = math.exp %9 : vector<64x256xf32>
    %11 = math.log1p %10 : vector<64x256xf32>
    %12 = arith.addf %6, %11 : vector<64x256xf32>
    %13 = arith.subf %3, %12 : vector<64x256xf32>
    %cst_5 = arith.constant -16.1180954 : f32
    %14 = vector.broadcast %cst_5 : f32 to vector<64x256xf32>
    %15 = arith.maximumf %13, %14 : vector<64x256xf32>
    %cst_6 = arith.constant 0.000000e+00 : f32
    %16 = vector.broadcast %cst_6 : f32 to vector<64x256xf32>
    %17 = arith.subf %16, %12 : vector<64x256xf32>
    %cst_7 = arith.constant -16.1180954 : f32
    %18 = vector.broadcast %cst_7 : f32 to vector<64x256xf32>
    %19 = arith.maximumf %17, %18 : vector<64x256xf32>
    %20 = arith.mulf %4, %15 : vector<64x256xf32>
    %cst_8 = arith.constant 1.000000e+00 : f32
    %21 = vector.broadcast %cst_8 : f32 to vector<64x256xf32>
    %22 = arith.subf %21, %4 : vector<64x256xf32>
    %cst_9 = arith.constant 5.000000e-01 : f32
    %23 = vector.broadcast %cst_9 : f32 to vector<64x256xf32>
    %24 = arith.mulf %23, %22 : vector<64x256xf32>
    %25 = arith.mulf %24, %19 : vector<64x256xf32>
    %26 = arith.addf %20, %25 : vector<64x256xf32>
    %27 = math.exp %26 : vector<64x256xf32>
    %cst_10 = arith.constant 1.000000e+00 : f32
    %28 = vector.broadcast %cst_10 : f32 to vector<64x256xf32>
    %29 = arith.subf %28, %27 : vector<64x256xf32>
    %cst_11 = arith.constant 0.000000e+00 : f32
    %30 = vector.broadcast %cst_11 : f32 to vector<64x256xf32>
    %31 = arith.subf %30, %29 : vector<64x256xf32>
    %32 = arith.mulf %31, %26 : vector<64x256xf32>
    %33 = vector.extract_strided_slice %32 {offsets = [0, 0], sizes = [8, 256], strides = [1, 1]} : vector<64x256xf32> to vector<8x256xf32>
    %34 = vector.extract_strided_slice %32 {offsets = [8, 0], sizes = [8, 256], strides = [1, 1]} : vector<64x256xf32> to vector<8x256xf32>
    %35 = arith.addf %33, %34 : vector<8x256xf32>
    %36 = vector.extract_strided_slice %32 {offsets = [16, 0], sizes = [8, 256], strides = [1, 1]} : vector<64x256xf32> to vector<8x256xf32>
    %37 = arith.addf %35, %36 : vector<8x256xf32>
    %38 = vector.extract_strided_slice %32 {offsets = [24, 0], sizes = [8, 256], strides = [1, 1]} : vector<64x256xf32> to vector<8x256xf32>
    %39 = arith.addf %37, %38 : vector<8x256xf32>
    %40 = vector.extract_strided_slice %32 {offsets = [32, 0], sizes = [8, 256], strides = [1, 1]} : vector<64x256xf32> to vector<8x256xf32>
    %41 = arith.addf %39, %40 : vector<8x256xf32>
    %42 = vector.extract_strided_slice %32 {offsets = [40, 0], sizes = [8, 256], strides = [1, 1]} : vector<64x256xf32> to vector<8x256xf32>
    %43 = arith.addf %41, %42 : vector<8x256xf32>
    %44 = vector.extract_strided_slice %32 {offsets = [48, 0], sizes = [8, 256], strides = [1, 1]} : vector<64x256xf32> to vector<8x256xf32>
    %45 = arith.addf %43, %44 : vector<8x256xf32>
    %46 = vector.extract_strided_slice %32 {offsets = [56, 0], sizes = [8, 256], strides = [1, 1]} : vector<64x256xf32> to vector<8x256xf32>
    %47 = arith.addf %45, %46 : vector<8x256xf32>
    %c0_12 = arith.constant 0 : index
    %c0_13 = arith.constant 0 : index
    %48 = vector.load %arg5[%c0_12, %c0_13] : memref<8x256xf32, #tpu.memory_space<vmem>>, vector<8x256xf32>
    %49 = arith.addf %48, %47 : vector<8x256xf32>
    %c0_14 = arith.constant 0 : index
    %c0_15 = arith.constant 0 : index
    %50 = vector.load %arg5[%c0_14, %c0_15] : memref<8x256xf32, #tpu.memory_space<vmem>>, vector<8x256xf32>
    tpu.vector_store %arg5[%c0_14, %c0_15], %49 {strides = array<i32>} : memref<8x256xf32, #tpu.memory_space<vmem>>, vector<8x256xf32>,
    %c0_i32_16 = arith.constant 0 : i32
    %51 = arith.cmpi eq, %arg1, %c0_i32_16 : i32
    %52 = arith.extui %51 : i1 to i32
    %c0_i32_17 = arith.constant 0 : i32
    %53 = arith.cmpi ne, %52, %c0_i32_17 : i32
    scf.if %53 {
      %c0_18 = arith.constant 0 : index
      %c0_19 = arith.constant 0 : index
      %54 = vector.load %arg5[%c0_18, %c0_19] : memref<8x256xf32, #tpu.memory_space<vmem>>, vector<8x256xf32>
      %cst_20 = arith.constant dense<0.000000e+00> : vector<256xf32>
      %55 = vector.multi_reduction <add>, %54, %cst_20 [0] : vector<8x256xf32> to vector<256xf32>
      %56 = vector.shape_cast %55 : vector<256xf32> to vector<1x256xf32>
      %57 = vector.shape_cast %56 : vector<1x256xf32> to vector<1x1x256xf32>
      %c0_21 = arith.constant 0 : index
      %c0_22 = arith.constant 0 : index
      %c0_23 = arith.constant 0 : index
      %58 = vector.load %arg4[%c0_21, %c0_22, %c0_23] : memref<1x1x256xf32, #tpu.memory_space<vmem>>, vector<1x1x256xf32>
      tpu.vector_store %arg4[%c0_21, %c0_22, %c0_23], %57 {strides = array<i32>} : memref<1x1x256xf32, #tpu.memory_space<vmem>>, vector<1x1x256xf32>,
    } else {
    }
    return
  }
  func.func @transform_0(%arg0: i32, %arg1: i32) -> (i32, i32) {
    %c1_i32 = arith.constant 1 : i32
    %0 = arith.muli %arg0, %c1_i32 : i32
    %1 = arith.addi %0, %arg1 : i32
    %c0_i32 = arith.constant 0 : i32
    %c0_i32_0 = arith.constant 0 : i32
    return %1, %c0_i32 : i32, i32
  }
  func.func @transform_1(%arg0: i32, %arg1: i32) -> (i32, i32) {
    %c1_i32 = arith.constant 1 : i32
    %0 = arith.muli %arg0, %c1_i32 : i32
    %1 = arith.addi %0, %arg1 : i32
    %c0_i32 = arith.constant 0 : i32
    %c0_i32_0 = arith.constant 0 : i32
    return %1, %c0_i32 : i32, i32
  }
  func.func @transform_2(%arg0: i32, %arg1: i32) -> (i32, i32, i32) {
    %c0_i32 = arith.constant 0 : i32
    %c0_i32_0 = arith.constant 0 : i32
    %c0_i32_1 = arith.constant 0 : i32
    return %arg0, %c0_i32, %c0_i32_0 : i32, i32, i32
  }
}

</mosaic_0001>

<bundles_post_ra>
// kernel: tpu_custom_call.1
= control target key start
LH: loop header
LB: loop body
LE: loop exit
PB: predicated region body
PF: predicated region fallthrough
CT: control target
= control target key end

     0   :  { %7 = vsyncpa [#allocation4], 0  ;;  %s1447_s0 = inlined_call_operand.hbm [shape: f32[64,256], index: 0, kind: input, shape index: {}]   ;;  %s1448_s1 = inlined_call_operand.hbm [shape: f32[64,256], index: 1, kind: input, shape index: {}]   ;;  %s1449_s2 = inlined_call_operand.hbm [shape: f32[1,1,256], index: 2, kind: output, shape index: {}]  }
   0x1   :  { %8 = vsyncpa [#allocation7], 0 }
   0x2   :  { %9 = vsyncpa [#allocation5], 0  ;;  %s806_s9 = smov [#allocation3]   ;;  %s734_s13 = scalar_lea.hbm %s1447_s0, 2048 }
   0x3   :  { %s20_s10 = sshll.u32 %s806_s9, 4  ;;  %p735_p0 = scmp.ne.s32.totalorder %s1447_s0, %s734_s13  ;;  %s21_s10 = int_to_ptr.vmem [resolvable:$true] %s20_s10 }
   0x4   :  { %p738_p1 = scmp.lt.u32.totalorder %s734_s13, %s1447_s0 }
   0x6   :  { %p740_p2 = pnand %p738_p1, %p735_p0 }
   0x8   :  { %743 = shalt.err (!%p740_p2)
}
   0x9   :  { %s744_s18 = scalar_lea.vmem %s21_s10, 2048  ;;  %p749_p4 = scmp.lt.s32.totalorder %s21_s10, %s21_s10 }
   0xa   :  { %p745_p3 = scmp.ne.s32.totalorder %s21_s10, %s744_s18  ;;  %p750_p5 = scmp.lt.s32.totalorder %s744_s18, %s744_s18 }
   0xc   :  { %p751_p6 = por %p750_p5, %p749_p4 }
   0xe   :  { %p752_p7 = pnand %p751_p6, %p745_p3 }
  0x10   :  { %755 = shalt.err (!%p752_p7)
}
  0x11   :  { %s807_s19 = smov 256   ;;  %s808_s20 = smov 16  }
  0x12   :  { %26 = dma.hbm_to_vmem [thread:$0]  %s1447_s0, 2048, %s21_s10, [#allocation4], %s807_s19, %s807_s19, %s808_s20  }
  0x13   :  { %s809_s23 = smov [#allocation6]   ;;  %s756_s27 = scalar_lea.hbm %s1448_s1, 2048 }
  0x14   :  { %s37_s24 = sshll.u32 %s809_s23, 4  ;;  %p757_p8 = scmp.ne.s32.totalorder %s1448_s1, %s756_s27  ;;  %s38_s24 = int_to_ptr.vmem [resolvable:$true] %s37_s24 }
  0x15   :  { %p760_p9 = scmp.lt.u32.totalorder %s756_s27, %s1448_s1 }
  0x17   :  { %p762_p10 = pnand %p760_p9, %p757_p8 }
  0x19   :  { %765 = shalt.err (!%p762_p10)
}
  0x1a   :  { %s766_s4 = scalar_lea.vmem %s38_s24, 2048  ;;  %p771_p12 = scmp.lt.s32.totalorder %s38_s24, %s38_s24 }
  0x1b   :  { %p767_p11 = scmp.ne.s32.totalorder %s38_s24, %s766_s4  ;;  %p772_p13 = scmp.lt.s32.totalorder %s766_s4, %s766_s4 }
  0x1d   :  { %p773_p0 = por %p772_p13, %p771_p12 }
  0x1f   :  { %p774_p1 = pnand %p773_p0, %p767_p11 }
  0x21   :  { %777 = shalt.err (!%p774_p1)
}
  0x22   :  { %43 = dma.hbm_to_vmem [thread:$0]  %s1448_s1, 2048, %s38_s24, [#allocation7], %s807_s19, %s807_s19, %s808_s20  }
  0x23   :  { %800 = dma.done.wait [#allocation4], 2048  }
  0x24   :  { %801 = vsyncadd [#allocation4], 4294965248 }
  0x25   :  { %802 = dma.done.wait [#allocation7], 2048  }
  0x26   :  { %803 = vsyncadd [#allocation7], 4294965248  ;;  %v851_v0 = vld [vmem:[#allocation3] sm:$0xff]  ;;  %v853_v1 = vld [vmem:[#allocation3 + $0x8] sm:$0xff]  ;;  %s811_s1 = smov [#allocation8]  }
  0x27   :  { %v855_v2 = vld [vmem:[#allocation3 + $0x10] sm:$0xff]  ;;  %v857_v3 = vld [vmem:[#allocation3 + $0x18] sm:$0xff]  ;;  %v859_v4 = vld [vmem:[#allocation3 + $0x20] sm:$0xff]  ;;  %v108_v17 = vand.u32 2147483647, %v851_v0  ;;  %s622_s6 = sshll.u32 %s811_s1, 4  ;;  %s623_s6 = int_to_ptr.vmem [resolvable:$true] %s622_s6 }
  0x28   :  { %v861_v5 = vld [vmem:[#allocation3 + $0x28] sm:$0xff]  ;;  %v864_v7 = vld [vmem:[#allocation3 + $0x30] sm:$0xff]  ;;  %v866_v8 = vld [vmem:[#allocation3 + $0x38] sm:$0xff]  ;;  %v109_v18 = vand.u32 2147483647, %v853_v1  ;;  %s778_s7 = scalar_lea.vmem %s623_s6, 32  ;;  %p783_p3 = scmp.lt.s32.totalorder %s623_s6, %s623_s6 }
  0x29   :  { %v868_v9 = vld [vmem:[#allocation3 + $0x40] sm:$0xff]  ;;  %v873_v13 = vld [vmem:[#allocation3 + $0x48] sm:$0xff]  ;;  %v875_v14 = vld [vmem:[#allocation3 + $0x50] sm:$0xff]  ;;  %v110_v19 = vand.u32 2147483647, %v855_v2  ;;  %v124_v34 = vsub.f32 0.0, %v108_v17  ;;  %p779_p2 = scmp.ne.s32.totalorder %s623_s6, %s778_s7  ;;  %p784_p4 = scmp.lt.s32.totalorder %s778_s7, %s778_s7 }
  0x2a   :  { %v111_v20 = vand.u32 2147483647, %v857_v3  ;;  %v883_v21 = vld [vmem:[#allocation3 + $0x58] sm:$0xff]  ;;  %v112_v25 = vand.u32 2147483647, %v859_v4  ;;  %v889_v26 = vld [vmem:[#allocation3 + $0x60] sm:$0xff] }
  0x2b   :  { %v891_v27 = vld [vmem:[#allocation3 + $0x68] sm:$0xff]  ;;  %v113_v30 = vand.u32 2147483647, %v861_v5  ;;  %v114_v32 = vand.u32 2147483647, %v864_v7  ;;  %v899_v35 = vld [vmem:[#allocation3 + $0x70] sm:$0xff]  ;;  %p785_p5 = por %p784_p4, %p783_p3 }
  0x2c   :  { %v115_v33 = vand.u32 2147483647, %v866_v8  ;;  %v116_v36 = vand.u32 2147483647, %v868_v9  ;;  %v125_v37 = vsub.f32 0.0, %v109_v18  ;;  %v126_v38 = vsub.f32 0.0, %v110_v19 }
  0x2d   :  { %v127_v39 = vsub.f32 0.0, %v111_v20  ;;  %v902_v40 = vld [vmem:[#allocation3 + $0x78] sm:$0xff]  ;;  %v117_v41 = vand.u32 2147483647, %v873_v13  ;;  %v118_v42 = vand.u32 2147483647, %v875_v14  ;;  %p786_p6 = pnand %p785_p5, %p779_p2 }
  0x2e   :  { %v128_v43 = vsub.f32 0.0, %v112_v25  ;;  %v119_v45 = vand.u32 2147483647, %v883_v21  ;;  %v120_v46 = vand.u32 2147483647, %v889_v26  ;;  %v129_v47 = vsub.f32 0.0, %v113_v30 }
  0x2f   :  { %v121_v48 = vand.u32 2147483647, %v891_v27  ;;  %v130_v49 = vsub.f32 0.0, %v114_v32  ;;  %v131_v50 = vsub.f32 0.0, %v115_v33  ;;  %v140_v51 = vmul.f32 1.442695, %v124_v34 }
  0x30   :  { %v142_v52 = vmul.f32 1.442695, %v125_v37  ;;  %v144_v53 = vmul.f32 1.442695, %v126_v38  ;;  %v146_v54 = vmul.f32 1.442695, %v127_v39 }
  0x31   :  { %v122_v55 = vand.u32 2147483647, %v899_v35  ;;  %v132_v56 = vsub.f32 0.0, %v116_v36  ;;  %638 = vpow2.f32 %v140_v51  ;;  %v148_v57 = vmul.f32 1.442695, %v128_v43  ;;  %v913_v20 = vld [vmem:[#allocation6] sm:$0xff] }
  0x32   :  { %v123_v58 = vand.u32 2147483647, %v902_v40  ;;  %v133_v59 = vsub.f32 0.0, %v117_v41  ;;  %640 = vpow2.f32 %v142_v52  ;;  %v150_v60 = vmul.f32 1.442695, %v129_v47  ;;  %v915_v33 = vld [vmem:[#allocation6 + $0x8] sm:$0xff] }
  0x33   :  { %v134_v62 = vsub.f32 0.0, %v118_v42  ;;  %642 = vpow2.f32 %v144_v53  ;;  %v152_v63 = vmul.f32 1.442695, %v130_v49  ;;  %v135_v17 = vsub.f32 0.0, %v119_v45  ;;  %v917_v34 = vld [vmem:[#allocation6 + $0x10] sm:$0xff]  ;;  %v920_v39 = vld [vmem:[#allocation6 + $0x18] sm:$0xff] }
  0x34   :  { %v136_v18 = vsub.f32 0.0, %v120_v46  ;;  %644 = vpow2.f32 %v146_v54  ;;  %v154_v19 = vmul.f32 1.442695, %v131_v50  ;;  %v137_v25 = vsub.f32 0.0, %v121_v48  ;;  %1474 = vst [vmem:[#allocation12_spill] sm:$0xff] %v917_v34  ;;  %1475 = vst [vmem:[#allocation13_spill] sm:$0xff] %v920_v39 }
  0x35   :  { %v138_v30 = vsub.f32 0.0, %v122_v55  ;;  %646 = vpow2.f32 %v148_v57  ;;  %v156_v32 = vmul.f32 1.442695, %v132_v56  ;;  %v139_v37 = vsub.f32 0.0, %v123_v58  ;;  %v922_v41 = vld [vmem:[#allocation6 + $0x20] sm:$0xff]  ;;  %v924_v42 = vld [vmem:[#allocation6 + $0x28] sm:$0xff] }
  0x36   :  { %648 = vpow2.f32 %v150_v60  ;;  %v158_v38 = vmul.f32 1.442695, %v133_v59  ;;  %1476 = vst [vmem:[#allocation14_spill] sm:$0xff] %v922_v41  ;;  %1477 = vst [vmem:[#allocation15_spill] sm:$0xff] %v924_v42  ;;  %v160_v45 = vmul.f32 1.442695, %v134_v62 }
  0x37   :  { %650 = vpow2.f32 %v152_v63  ;;  %v927_v46 = vld [vmem:[#allocation6 + $0x30] sm:$0xff]  ;;  %v929_v47 = vld [vmem:[#allocation6 + $0x38] sm:$0xff]  ;;  %v931_v48 = vld [vmem:[#allocation6 + $0x40] sm:$0xff]  ;;  %v162_v49 = vmul.f32 1.442695, %v135_v17  ;;  %v412_v50 = vsub.f32 1.0, %v913_v20 }
  0x38   :  { %1478 = vst [vmem:[#allocation16_spill] sm:$0xff] %v927_v46  ;;  %1479 = vst [vmem:[#allocation17_spill] sm:$0xff] %v929_v47  ;;  %652 = vpow2.f32 %v154_v19  ;;  %v164_v51 = vmul.f32 1.442695, %v136_v18  ;;  %v166_v52 = vmul.f32 1.442695, %v137_v25 }
  0x39   :  { %1480 = vst [vmem:[#allocation18_spill] sm:$0xff] %v931_v48  ;;  %654 = vpow2.f32 %v156_v32  ;;  %v168_v53 = vmul.f32 1.442695, %v138_v30  ;;  %v934_v54 = vld [vmem:[#allocation6 + $0x48] sm:$0xff]  ;;  %v936_v55 = vld [vmem:[#allocation6 + $0x50] sm:$0xff]  ;;  %v413_v57 = vsub.f32 1.0, %v915_v33 }
  0x3a   :  { %1481 = vst [vmem:[#allocation19_spill] sm:$0xff] %v934_v54  ;;  %1482 = vst [vmem:[#allocation20_spill] sm:$0xff] %v936_v55  ;;  %656 = vpow2.f32 %v158_v38  ;;  %v170_v56 = vmul.f32 1.442695, %v139_v37  ;;  %v414_v58 = vsub.f32 1.0, %v917_v34  ;;  %v942_v60 = vld [vmem:[#allocation6 + $0x58] sm:$0xff] }
  0x3b   :  { %v940_v59 = vpop.eup %638  ;;  %1483 = vst [vmem:[#allocation21_spill] sm:$0xff] %v942_v60  ;;  %v944_v62 = vld [vmem:[#allocation6 + $0x60] sm:$0xff]  ;;  %658 = vpow2.f32 %v160_v45  ;;  %v415_v63 = vsub.f32 1.0, %v920_v39  ;;  %v416_v17 = vsub.f32 1.0, %v922_v41  ;;  %v417_v18 = vsub.f32 1.0, %v924_v42  ;;  %v951_v25 = vld [vmem:[#allocation6 + $0x68] sm:$0xff] }
  0x3c   :  { %1484 = vst [vmem:[#allocation22_spill] sm:$0xff] %v944_v62  ;;  %v949_v19 = vpop.eup %640  ;;  %1485 = vst [vmem:[#allocation23_spill] sm:$0xff] %v951_v25  ;;  %v953_v30 = vld [vmem:[#allocation6 + $0x70] sm:$0xff]  ;;  %660 = vpow2.f32 %v162_v49  ;;  %v960_v43 = vld [vmem:[#allocation6 + $0x78] sm:$0xff]  ;;  %v172_v36 = vadd.f32 1.0, %v940_v59  ;;  %v979_v24 = vmul.f32 0.5, %v412_v50 }
  0x3d   :  { %1486 = vst [vmem:[#allocation24_spill] sm:$0xff] %v953_v30  ;;  %v958_v45 = vpop.eup %642  ;;  %1487 = vst [vmem:[#allocation25_spill] sm:$0xff] %v960_v43  ;;  %662 = vpow2.f32 %v164_v51  ;;  %v181_v49 = vadd.f32 1.0, %v949_v19  ;;  %v984_v38 = vmul.f32 0.5, %v413_v57  ;;  %v986_v23 = vmul.f32 0.5, %v414_v58 }
  0x3e   :  { %v965_v31 = vpop.eup %644  ;;  %664 = vpow2.f32 %v166_v52  ;;  %v190_v51 = vadd.f32 1.0, %v958_v45  ;;  %1488 = vst [vmem:[#allocation26_spill] sm:$0xff] %v979_v24  ;;  %v992_v22 = vmul.f32 0.5, %v415_v63  ;;  %v178_v44 = vand.u32 2147483647, %v940_v59 }
  0x3f   :  { %v970_v32 = vpop.eup %646  ;;  %666 = vpow2.f32 %v168_v53  ;;  %v199_v52 = vadd.f32 1.0, %v965_v31  ;;  %v175_v53 = vmul.f32 -0.5, %v940_v59  ;;  %1489 = vst [vmem:[#allocation27_spill] sm:$0xff] %v984_v38  ;;  %1490 = vst [vmem:[#allocation28_spill] sm:$0xff] %v986_v23  ;;  %v202_v57 = vmul.f32 -0.5, %v965_v31 }
  0x40   :  { %v975_v28 = vpop.eup %648  ;;  %668 = vpow2.f32 %v170_v56  ;;  %v184_v56 = vmul.f32 -0.5, %v949_v19  ;;  %v208_v61 = vadd.f32 1.0, %v970_v32  ;;  %1491 = vst [vmem:[#allocation29_spill] sm:$0xff] %v992_v22  ;;  %v187_v16 = vand.u32 2147483647, %v949_v19 }
  0x41   :  { %v981_v37 = vpop.eup %650  ;;  %670 = vlog2.f32 %v172_v36  ;;  %v193_v36 = vmul.f32 -0.5, %v958_v45  ;;  %v1003_v15 = vmul.f32 0.5, %v416_v17  ;;  %v176_v12 = vadd.f32 1.0, %v175_v53 }
  0x42   :  { %v988_v29 = vpop.eup %652  ;;  %672 = vlog2.f32 %v181_v49  ;;  %v217_v49 = vadd.f32 1.0, %v975_v28  ;;  %v211_v11 = vmul.f32 -0.5, %v970_v32  ;;  %v185_v6 = vadd.f32 1.0, %v184_v56 }
  0x43   :  { %v994_v50 = vpop.eup %654  ;;  %674 = vlog2.f32 %v190_v51  ;;  %1492 = vst [vmem:[#allocation30_spill] sm:$0xff] %v1003_v15  ;;  %v1008_v51 = vmul.f32 0.5, %v417_v18  ;;  %v196_v43 = vand.u32 2147483647, %v958_v45  ;;  %vm1016_vm0 = vcmp.lt.f32.partialorder %v178_v44, 0.0004427343 }
  0x44   :  { %v999_v58 = vpop.eup %656  ;;  %676 = vlog2.f32 %v199_v52  ;;  %v226_v52 = vadd.f32 1.0, %v981_v37  ;;  %v194_v53 = vadd.f32 1.0, %v193_v36  ;;  %v205_v15 = vand.u32 2147483647, %v965_v31 }
  0x45   :  { %v1005_v63 = vpop.eup %658  ;;  %678 = vlog2.f32 %v208_v61  ;;  %1493 = vst [vmem:[#allocation31_spill] sm:$0xff] %v1008_v51  ;;  %v203_v61 = vadd.f32 1.0, %v202_v57  ;;  %v214_v18 = vand.u32 2147483647, %v970_v32  ;;  %vm1024_vm1 = vcmp.lt.f32.partialorder %v187_v16, 0.0004427343 }
  0x46   :  { %v1010_v10 = vpop.eup %660  ;;  %680 = vlog2.f32 %v217_v49  ;;  %v220_v49 = vmul.f32 -0.5, %v975_v28  ;;  %v229_v44 = vmul.f32 -0.5, %v981_v37  ;;  %v235_v25 = vadd.f32 1.0, %v988_v29 }
  0x47   :  { %v1014_v30 = vpop.eup %662  ;;  %682 = vlog2.f32 %v226_v52  ;;  %v1034_v36 = vmul.f32 %v940_v59, %v176_v12  ;;  %v212_v57 = vadd.f32 1.0, %v211_v11  ;;  %v223_v22 = vand.u32 2147483647, %v975_v28 }
  0x48   :  { %v1022_v51 = vpop.eup %664  ;;  %v238_v16 = vmul.f32 -0.5, %v988_v29  ;;  %v1041_v38 = vmul.f32 %v949_v19, %v185_v6  ;;  %vm1043_vm2 = vcmp.lt.f32.partialorder %v196_v43, 0.0004427343  ;;  %v244_v24 = vadd.f32 1.0, %v994_v50 }
  0x49   :  { %v1031_v62 = vpop.eup %666  ;;  %v247_v60 = vmul.f32 -0.5, %v994_v50  ;;  %v1050_v11 = vmul.f32 %v958_v45, %v194_v53  ;;  %v1053_v59 = vmul.f32 %v965_v31, %v203_v61  ;;  %vm1055_vm3 = vcmp.lt.f32.partialorder %v205_v15, 0.0004427343 }
  0x4a   :  { %v1038_v23 = vpop.eup %668  ;;  %v253_v6 = vadd.f32 1.0, %v999_v58  ;;  %vm1060_vm4 = vcmp.lt.f32.partialorder %v214_v18, 0.0004427343  ;;  %v221_v54 = vadd.f32 1.0, %v220_v49  ;;  %v230_v48 = vadd.f32 1.0, %v229_v44 }
  0x4b   :  { %v671_v12 = vpop.eup %670  ;;  %v232_v47 = vand.u32 2147483647, %v981_v37  ;;  %684 = vlog2.f32 %v235_v25  ;;  %v1066_v31 = vmul.f32 %v970_v32, %v212_v57  ;;  %vm1068_vm5 = vcmp.lt.f32.partialorder %v223_v22, 0.0004427343 }
  0x4c   :  { %v673_v43 = vpop.eup %672  ;;  %v239_v53 = vadd.f32 1.0, %v238_v16  ;;  %686 = vlog2.f32 %v244_v24  ;;  %v1072_v18 = vmul.f32 0.6931472, %v671_v12  ;;  %v241_v46 = vand.u32 2147483647, %v988_v29 }
  0x4d   :  { %v675_v45 = vpop.eup %674  ;;  %v248_v49 = vadd.f32 1.0, %v247_v60  ;;  %688 = vlog2.f32 %v253_v6  ;;  %v1075_v42 = vmul.f32 0.6931472, %v673_v43  ;;  %v250_v25 = vand.u32 2147483647, %v994_v50 }
  0x4e   :  { %v677_v61 = vpop.eup %676  ;;  %v256_v32 = vmul.f32 -0.5, %v999_v58  ;;  %v262_v22 = vadd.f32 1.0, %v1005_v63  ;;  %v1081_v16 = vmul.f32 %v975_v28, %v221_v54  ;;  %v1084_v24 = vmul.f32 %v981_v37, %v230_v48 }
  0x4f   :  { %v679_v44 = vpop.eup %678  ;;  %vm1086_vm6 = vcmp.lt.f32.partialorder %v232_v47, 0.0004427343  ;;  %v265_v60 = vmul.f32 -0.5, %v1005_v63  ;;  %v1091_v6 = vmul.f32 0.6931472, %v675_v45  ;;  %v1094_v43 = vmul.f32 %v988_v29, %v239_v53 }
  0x50   :  { %v681_v57 = vpop.eup %680  ;;  %v259_v41 = vand.u32 2147483647, %v999_v58  ;;  %690 = vlog2.f32 %v262_v22  ;;  %v1101_v47 = vmul.f32 0.6931472, %v677_v61  ;;  %vm1103_vm7 = vcmp.lt.f32.partialorder %v241_v46, 0.0004427343 }
  0x51   :  { %v683_v39 = vpop.eup %682  ;;  %v1108_v54 = vmul.f32 %v994_v50, %v248_v49  ;;  %v271_v29 = vadd.f32 1.0, %v1010_v10  ;;  %v1115_v45 = vmul.f32 0.6931472, %v679_v44  ;;  %v1117_v53 = vmul.f32 0.6931472, %v681_v57 }
  0x52   :  { %vm1119_vm8 = vcmp.lt.f32.partialorder %v250_v25, 0.0004427343  ;;  %v257_v46 = vadd.f32 1.0, %v256_v32  ;;  %v266_v22 = vadd.f32 1.0, %v265_v60  ;;  %v268_v50 = vand.u32 2147483647, %v1005_v63 }
  0x53   :  { %692 = vlog2.f32 %v271_v29  ;;  %v280_v49 = vadd.f32 1.0, %v1014_v30  ;;  %v198_v37 = vsel %vm1043_vm2, %v1050_v11, %v1091_v6  ;;  %v1129_v44 = vmul.f32 0.6931472, %v683_v39 }
  0x54   :  { %vm1131_vm9 = vcmp.lt.f32.partialorder %v259_v41, 0.0004427343  ;;  %v277_v25 = vand.u32 2147483647, %v1010_v10  ;;  %v207_v60 = vsel %vm1055_vm3, %v1053_v59, %v1101_v47  ;;  %v274_v29 = vmul.f32 -0.5, %v1010_v10 }
  0x55   :  { %v685_v32 = vpop.eup %684  ;;  %694 = vlog2.f32 %v280_v49  ;;  %v289_v52 = vadd.f32 1.0, %v1022_v51  ;;  %v216_v39 = vsel %vm1060_vm4, %v1066_v31, %v1115_v45  ;;  %v225_v41 = vsel %vm1068_vm5, %v1081_v16, %v1117_v53 }
  0x56   :  { %v687_v11 = vpop.eup %686  ;;  %v258_v6 = vmul.f32 %v999_v58, %v257_v46  ;;  %v283_v55 = vmul.f32 -0.5, %v1014_v30  ;;  %v267_v47 = vmul.f32 %v1005_v63, %v266_v22  ;;  %vm1153_vm10 = vcmp.lt.f32.partialorder %v268_v50, 0.0004427343 }
  0x57   :  { %v689_v59 = vpop.eup %688  ;;  %696 = vlog2.f32 %v289_v52  ;;  %v292_v19 = vmul.f32 -0.5, %v1022_v51  ;;  %v234_v31 = vsel %vm1086_vm6, %v1084_v24, %v1129_v44  ;;  %v237_v15 = vmul.f32 0.6931472, %v685_v32 }
  0x58   :  { %vm1162_vm11 = vcmp.lt.f32.partialorder %v277_v25, 0.0004427343  ;;  %v298_v16 = vadd.f32 1.0, %v1031_v62  ;;  %v246_v63 = vmul.f32 0.6931472, %v687_v11  ;;  %v275_v45 = vadd.f32 1.0, %v274_v29 }
  0x59   :  { %v286_v53 = vand.u32 2147483647, %v1014_v30  ;;  %v301_v46 = vmul.f32 -0.5, %v1031_v62  ;;  %v255_v50 = vmul.f32 0.6931472, %v689_v59  ;;  %v284_v52 = vadd.f32 1.0, %v283_v55 }
  0x5a   :  { %v691_v22 = vpop.eup %690  ;;  %698 = vlog2.f32 %v298_v16  ;;  %v307_v12 = vadd.f32 1.0, %v1038_v23  ;;  %v293_v24 = vadd.f32 1.0, %v292_v19  ;;  %v295_v44 = vand.u32 2147483647, %v1022_v51 }
  0x5b   :  { %v304_v25 = vand.u32 2147483647, %v1031_v62  ;;  %v310_v32 = vmul.f32 -0.5, %v1038_v23  ;;  %v243_v29 = vsel %vm1103_vm7, %v1094_v43, %v237_v15  ;;  %v264_v11 = vmul.f32 0.6931472, %v691_v22 }
  0x5c   :  { %v302_v28 = vadd.f32 1.0, %v301_v46  ;;  %700 = vlog2.f32 %v307_v12  ;;  %v252_v55 = vsel %vm1119_vm8, %v1108_v54, %v246_v63  ;;  %v276_v59 = vmul.f32 %v1010_v10, %v275_v45 }
  0x5d   :  { %v693_v34 = vpop.eup %692  ;;  %vm1180_vm12 = vcmp.lt.f32.partialorder %v286_v53, 0.0004427343  ;;  %v313_v16 = vand.u32 2147483647, %v1038_v23  ;;  %v261_v48 = vsel %vm1131_vm9, %v258_v6, %v255_v50  ;;  %v285_v15 = vmul.f32 %v1014_v30, %v284_v52 }
  0x5e   :  { %v273_v43 = vmul.f32 0.6931472, %v693_v34  ;;  %v311_v46 = vadd.f32 1.0, %v310_v32  ;;  %v294_v12 = vmul.f32 %v1022_v51, %v293_v24  ;;  %vm1189_vm13 = vcmp.lt.f32.partialorder %v295_v44, 0.0004427343 }
  0x5f   :  { %v695_v22 = vpop.eup %694  ;;  %vm1193_vm14 = vcmp.lt.f32.partialorder %v304_v25, 0.0004427343  ;;  %v1524_v61 = vmax.f32 %v851_v0, 0.0  ;;  %v1525_v34 = vsel %vm1016_vm0, %v1034_v36, %v1072_v18  ;;  %v270_v51 = vsel %vm1153_vm10, %v267_v47, %v264_v11 }
  0x60   :  { %v282_v57 = vmul.f32 0.6931472, %v695_v22  ;;  %v303_v6 = vmul.f32 %v1031_v62, %v302_v28  ;;  %v1526_v63 = vmax.f32 %v853_v1, 0.0  ;;  %v1527_v45 = vsel %vm1024_vm1, %v1041_v38, %v1075_v42 }
  0x61   :  { %v1204_v30 = vadd.f32 %v1525_v34, %v1524_v61  ;;  %v697_v17 = vpop.eup %696  ;;  %v279_v36 = vsel %vm1162_vm11, %v276_v59, %v273_v43  ;;  %vm1220_vm15 = vcmp.lt.f32.partialorder %v313_v16, 0.0004427343  ;;  %v1530_v47 = vmax.f32 %v855_v2, 0.0 }
  0x62   :  { %v1216_v53 = vadd.f32 %v1527_v45, %v1526_v63  ;;  %v1531_v28 = vmax.f32 %v857_v3, 0.0  ;;  %v288_v42 = vsel %vm1180_vm12, %v285_v15, %v282_v57  ;;  %v291_v38 = vmul.f32 0.6931472, %v697_v17 }
  0x63   :  { %v1226_v62 = vadd.f32 %v198_v37, %v1530_v47  ;;  %v312_v49 = vmul.f32 %v1038_v23, %v311_v46  ;;  %v1532_v58 = vmax.f32 %v859_v4, 0.0  ;;  %v1533_v52 = vmax.f32 %v861_v5, 0.0 }
  0x64   :  { %v1230_v56 = vadd.f32 %v207_v60, %v1531_v28  ;;  %v1534_v37 = vmax.f32 %v864_v7, 0.0  ;;  %v1535_v60 = vmax.f32 %v866_v8, 0.0  ;;  %v1536_v32 = vmax.f32 %v868_v9, 0.0  ;;  %v699_v23 = vpop.eup %698 }
  0x65   :  { %v1237_v50 = vadd.f32 %v216_v39, %v1532_v58  ;;  %v1241_v24 = vadd.f32 %v225_v41, %v1533_v52  ;;  %v297_v39 = vsel %vm1189_vm13, %v294_v12, %v291_v38  ;;  %v1537_v59 = vmax.f32 %v873_v13, 0.0 }
  0x66   :  { %v1245_v44 = vadd.f32 %v234_v31, %v1534_v37  ;;  %v1249_v25 = vadd.f32 %v243_v29, %v1535_v60  ;;  %v1253_v11 = vadd.f32 %v252_v55, %v1536_v32  ;;  %v1538_v19 = vmax.f32 %v875_v14, 0.0  ;;  %v701_v22 = vpop.eup %700 }
  0x67   :  { %v1259_v41 = vadd.f32 %v261_v48, %v1537_v59  ;;  %v1539_v16 = vmax.f32 %v883_v21, 0.0  ;;  %v300_v43 = vmul.f32 0.6931472, %v699_v23  ;;  %v1540_v55 = vmax.f32 %v889_v26, 0.0 }
  0x68   :  { %v1263_v31 = vadd.f32 %v270_v51, %v1538_v19  ;;  %v332_v46 = vsub.f32 %v851_v0, %v1204_v30  ;;  %v333_v48 = vsub.f32 %v853_v1, %v1216_v53  ;;  %v1541_v12 = vmax.f32 %v891_v27, 0.0 }
  0x69   :  { %v1267_v29 = vadd.f32 %v279_v36, %v1539_v16  ;;  %v1271_v15 = vadd.f32 %v288_v42, %v1540_v55  ;;  %v334_v61 = vsub.f32 %v855_v2, %v1226_v62  ;;  %v335_v34 = vsub.f32 %v857_v3, %v1230_v56 }
  0x6a   :  { %v1279_v54 = vadd.f32 %v297_v39, %v1541_v12  ;;  %v336_v51 = vsub.f32 %v859_v4, %v1237_v50  ;;  %v306_v0 = vsel %vm1193_vm14, %v303_v6, %v300_v43  ;;  %v309_v57 = vmul.f32 0.6931472, %v701_v22 }
  0x6b   :  { %v337_v1 = vsub.f32 %v861_v5, %v1241_v24  ;;  %v338_v63 = vsub.f32 %v864_v7, %v1245_v44  ;;  %v1542_v45 = vmax.f32 %v899_v35, 0.0  ;;  %v339_v2 = vsub.f32 %v866_v8, %v1249_v25 }
  0x6c   :  { %v340_v3 = vsub.f32 %v868_v9, %v1253_v11  ;;  %v341_v4 = vsub.f32 %v873_v13, %v1259_v41  ;;  %v315_v10 = vsel %vm1220_vm15, %v312_v49, %v309_v57  ;;  %v342_v5 = vsub.f32 %v875_v14, %v1263_v31 }
  0x6d   :  { %v330_v17 = vadd.f32 %v306_v0, %v1542_v45  ;;  %v343_v7 = vsub.f32 %v883_v21, %v1267_v29  ;;  %v344_v6 = vsub.f32 %v889_v26, %v1271_v15  ;;  %v1543_v8 = vmax.f32 %v902_v40, 0.0 }
  0x6e   :  { %v345_v9 = vsub.f32 %v891_v27, %v1279_v54  ;;  %v348_v47 = vmax.f32 %v332_v46, -16.118095  ;;  %v349_v13 = vmax.f32 %v333_v48, -16.118095  ;;  %v350_v28 = vmax.f32 %v334_v61, -16.118095 }
  0x6f   :  { %v331_v36 = vadd.f32 %v315_v10, %v1543_v8  ;;  %v346_v18 = vsub.f32 %v899_v35, %v330_v17  ;;  %v351_v42 = vmax.f32 %v335_v34, -16.118095  ;;  %v352_v38 = vmax.f32 %v336_v51, -16.118095  ;;  %v1548_v8 = vld [vmem:[#allocation16_spill] sm:$0xff] }
  0x70   :  { %v353_v14 = vmax.f32 %v337_v1, -16.118095  ;;  %v354_v49 = vmax.f32 %v338_v63, -16.118095  ;;  %v355_v58 = vmax.f32 %v339_v2, -16.118095 }
  0x71   :  { %v347_v21 = vsub.f32 %v902_v40, %v331_v36  ;;  %v356_v52 = vmax.f32 %v340_v3, -16.118095  ;;  %v357_v26 = vmax.f32 %v341_v4, -16.118095  ;;  %v358_v37 = vmax.f32 %v342_v5, -16.118095 }
  0x72   :  { %v359_v60 = vmax.f32 %v343_v7, -16.118095  ;;  %v360_v32 = vmax.f32 %v344_v6, -16.118095  ;;  %v361_v23 = vmax.f32 %v345_v9, -16.118095 }
  0x73   :  { %v362_v39 = vmax.f32 %v346_v18, -16.118095  ;;  %v364_v27 = vsub.f32 0.0, %v1204_v30  ;;  %v365_v59 = vsub.f32 0.0, %v1216_v53  ;;  %v366_v35 = vsub.f32 0.0, %v1226_v62  ;;  %v1545_v2 = vld [vmem:[#allocation13_spill] sm:$0xff] }
  0x74   :  { %v367_v19 = vsub.f32 0.0, %v1230_v56  ;;  %v368_v16 = vsub.f32 0.0, %v1237_v50  ;;  %v369_v43 = vsub.f32 0.0, %v1241_v24  ;;  %v370_v40 = vsub.f32 0.0, %v1245_v44  ;;  %v1546_v5 = vld [vmem:[#allocation14_spill] sm:$0xff]  ;;  %v1549_v9 = vld [vmem:[#allocation17_spill] sm:$0xff] }
  0x75   :  { %v363_v55 = vmax.f32 %v347_v21, -16.118095  ;;  %v371_v46 = vsub.f32 0.0, %v1249_v25  ;;  %v372_v48 = vsub.f32 0.0, %v1253_v11  ;;  %v373_v22 = vsub.f32 0.0, %v1259_v41  ;;  %v1551_v18 = vld [vmem:[#allocation19_spill] sm:$0xff] }
  0x76   :  { %v374_v30 = vsub.f32 0.0, %v1263_v31  ;;  %v375_v53 = vsub.f32 0.0, %v1267_v29  ;;  %v376_v62 = vsub.f32 0.0, %v1271_v15  ;;  %v377_v56 = vsub.f32 0.0, %v1279_v54  ;;  %v1544_v15 = vld [vmem:[#allocation12_spill] sm:$0xff] }
  0x77   :  { %v378_v50 = vsub.f32 0.0, %v330_v17  ;;  %v379_v12 = vsub.f32 0.0, %v331_v36  ;;  %v380_v24 = vmax.f32 %v364_v27, -16.118095  ;;  %v381_v61 = vmax.f32 %v365_v59, -16.118095 }
  0x78   :  { %v382_v44 = vmax.f32 %v366_v35, -16.118095  ;;  %v383_v34 = vmax.f32 %v367_v19, -16.118095  ;;  %v384_v51 = vmax.f32 %v368_v16, -16.118095  ;;  %v396_v25 = vmul.f32 %v348_v47, %v913_v20 }
  0x79   :  { %v385_v11 = vmax.f32 %v369_v43, -16.118095  ;;  %v386_v0 = vmax.f32 %v370_v40, -16.118095  ;;  %v387_v41 = vmax.f32 %v371_v46, -16.118095  ;;  %v397_v31 = vmul.f32 %v349_v13, %v915_v33 }
  0x7a   :  { %v388_v57 = vmax.f32 %v372_v48, -16.118095  ;;  %v389_v29 = vmax.f32 %v373_v22, -16.118095  ;;  %v390_v1 = vmax.f32 %v374_v30, -16.118095  ;;  %v398_v63 = vmul.f32 %v350_v28, %v1544_v15 }
  0x7b   :  { %v391_v54 = vmax.f32 %v375_v53, -16.118095  ;;  %v392_v45 = vmax.f32 %v376_v62, -16.118095  ;;  %v393_v17 = vmax.f32 %v377_v56, -16.118095  ;;  %v399_v3 = vmul.f32 %v351_v42, %v1545_v2 }
  0x7c   :  { %v394_v4 = vmax.f32 %v378_v50, -16.118095  ;;  %v395_v10 = vmax.f32 %v379_v12, -16.118095  ;;  %v400_v7 = vmul.f32 %v352_v38, %v1546_v5  ;;  %v1547_v20 = vld [vmem:[#allocation15_spill] sm:$0xff]  ;;  %v402_v36 = vmul.f32 %v354_v49, %v1548_v8  ;;  %v1550_v47 = vld [vmem:[#allocation18_spill] sm:$0xff] }
  0x7d   :  { %v401_v6 = vmul.f32 %v353_v14, %v1547_v20  ;;  %v403_v33 = vmul.f32 %v355_v58, %v1549_v9  ;;  %v404_v13 = vmul.f32 %v356_v52, %v1550_v47  ;;  %v405_v21 = vmul.f32 %v357_v26, %v1551_v18  ;;  %v1552_v28 = vld [vmem:[#allocation20_spill] sm:$0xff]  ;;  %v1553_v59 = vld [vmem:[#allocation21_spill] sm:$0xff]  ;;  %v1555_v16 = vld [vmem:[#allocation26_spill] sm:$0xff] }
  0x7e   :  { %v406_v27 = vmul.f32 %v358_v37, %v1552_v28  ;;  %v407_v35 = vmul.f32 %v359_v60, %v1553_v59  ;;  %v1554_v42 = vsub.f32 1.0, %v1548_v8  ;;  %v444_v43 = vmul.f32 %v1555_v16, %v380_v24  ;;  %v1557_v40 = vld [vmem:[#allocation27_spill] sm:$0xff]  ;;  %v1558_v46 = vld [vmem:[#allocation28_spill] sm:$0xff]  ;;  %v1559_v48 = vld [vmem:[#allocation29_spill] sm:$0xff] }
  0x7f   :  { %v1556_v38 = vsub.f32 1.0, %v1549_v9  ;;  %v445_v49 = vmul.f32 %v1557_v40, %v381_v61  ;;  %v446_v58 = vmul.f32 %v1558_v46, %v382_v44  ;;  %v447_v52 = vmul.f32 %v1559_v48, %v383_v34  ;;  %v1560_v22 = vld [vmem:[#allocation22_spill] sm:$0xff]  ;;  %v1561_v30 = vld [vmem:[#allocation23_spill] sm:$0xff]  ;;  %v1564_v50 = vld [vmem:[#allocation24_spill] sm:$0xff] }
  0x80   :  { %v434_v19 = vmul.f32 0.5, %v1554_v42  ;;  %v408_v26 = vmul.f32 %v360_v32, %v1560_v22  ;;  %v409_v37 = vmul.f32 %v361_v23, %v1561_v30  ;;  %v1562_v60 = vsub.f32 1.0, %v1550_v47  ;;  %v1563_v62 = vld [vmem:[#allocation30_spill] sm:$0xff]  ;;  %v1565_v24 = vld [vmem:[#allocation25_spill] sm:$0xff]  ;;  %v1567_v5 = vld [vmem:[#allocation31_spill] sm:$0xff] }
  0x81   :  { %v435_v14 = vmul.f32 0.5, %v1556_v38  ;;  %v448_v56 = vmul.f32 %v1563_v62, %v384_v51  ;;  %v410_v12 = vmul.f32 %v362_v39, %v1564_v50  ;;  %v411_v15 = vmul.f32 %v363_v55, %v1565_v24 }
  0x82   :  { %v436_v53 = vmul.f32 0.5, %v1562_v60  ;;  %v1566_v2 = vsub.f32 1.0, %v1551_v18  ;;  %v449_v44 = vmul.f32 %v1567_v5, %v385_v11  ;;  %v1568_v34 = vsub.f32 1.0, %v1552_v28 }
  0x83   :  { %v1569_v32 = vsub.f32 1.0, %v1553_v59  ;;  %v450_v8 = vmul.f32 %v434_v19, %v386_v0  ;;  %v1363_v9 = vadd.f32 %v444_v43, %v396_v25  ;;  %v451_v47 = vmul.f32 %v435_v14, %v387_v41 }
  0x84   :  { %v437_v61 = vmul.f32 0.5, %v1566_v2  ;;  %v438_v20 = vmul.f32 0.5, %v1568_v34  ;;  %v1365_v51 = vadd.f32 %v445_v49, %v397_v31  ;;  %v1367_v39 = vadd.f32 %v446_v58, %v398_v63 }
  0x85   :  { %v439_v23 = vmul.f32 0.5, %v1569_v32  ;;  %v1369_v55 = vadd.f32 %v447_v52, %v399_v3  ;;  %v1570_v18 = vsub.f32 1.0, %v1560_v22  ;;  %v1571_v11 = vsub.f32 1.0, %v1561_v30 }
  0x86   :  { %v452_v16 = vmul.f32 %v436_v53, %v388_v57  ;;  %v1375_v38 = vadd.f32 %v448_v56, %v400_v7  ;;  %v1572_v0 = vsub.f32 1.0, %v1564_v50  ;;  %v1573_v41 = vsub.f32 1.0, %v1565_v24 }
  0x87   :  { %v440_v42 = vmul.f32 0.5, %v1570_v18  ;;  %v441_v28 = vmul.f32 0.5, %v1571_v11  ;;  %v453_v59 = vmul.f32 %v437_v61, %v389_v29  ;;  %v1381_v63 = vadd.f32 %v449_v44, %v401_v6 }
  0x88   :  { %v442_v25 = vmul.f32 0.5, %v1572_v0  ;;  %v443_v31 = vmul.f32 0.5, %v1573_v41  ;;  %v454_v3 = vmul.f32 %v438_v20, %v390_v1  ;;  %v455_v19 = vmul.f32 %v439_v23, %v391_v54 }
  0x89   :  { %v1383_v43 = vadd.f32 %v450_v8, %v402_v36  ;;  %v476_v14 = vmul.f32 1.442695, %v1363_v9  ;;  %v1386_v40 = vadd.f32 %v451_v47, %v403_v33  ;;  %v478_v57 = vmul.f32 1.442695, %v1365_v51 }
  0x8a   :  { %v480_v7 = vmul.f32 1.442695, %v1367_v39  ;;  %v482_v49 = vmul.f32 1.442695, %v1369_v55  ;;  %v456_v46 = vmul.f32 %v440_v42, %v392_v45  ;;  %v1391_v58 = vadd.f32 %v452_v16, %v404_v13 }
  0x8b   :  { %702 = vpow2.f32 %v476_v14  ;;  %v484_v29 = vmul.f32 1.442695, %v1375_v38  ;;  %v457_v1 = vmul.f32 %v441_v28, %v393_v17  ;;  %v1394_v54 = vadd.f32 %v453_v59, %v405_v21 }
  0x8c   :  { %704 = vpow2.f32 %v478_v57  ;;  %v486_v6 = vmul.f32 1.442695, %v1381_v63  ;;  %v458_v36 = vmul.f32 %v442_v25, %v394_v4  ;;  %v1397_v33 = vadd.f32 %v454_v3, %v406_v27 }
  0x8d   :  { %706 = vpow2.f32 %v480_v7  ;;  %v488_v48 = vmul.f32 1.442695, %v1383_v43  ;;  %v459_v52 = vmul.f32 %v443_v31, %v395_v10  ;;  %v1400_v22 = vadd.f32 %v455_v19, %v407_v35 }
  0x8e   :  { %708 = vpow2.f32 %v482_v49  ;;  %v490_v45 = vmul.f32 1.442695, %v1386_v40  ;;  %v1403_v13 = vadd.f32 %v456_v46, %v408_v26  ;;  %v492_v17 = vmul.f32 1.442695, %v1391_v58 }
  0x8f   :  { %710 = vpow2.f32 %v484_v29  ;;  %v1406_v21 = vadd.f32 %v457_v1, %v409_v37  ;;  %v494_v4 = vmul.f32 1.442695, %v1394_v54  ;;  %v1409_v27 = vadd.f32 %v458_v36, %v410_v12 }
  0x90   :  { %712 = vpow2.f32 %v486_v6  ;;  %v496_v10 = vmul.f32 1.442695, %v1397_v33  ;;  %v1412_v35 = vadd.f32 %v459_v52, %v411_v15  ;;  %v498_v30 = vmul.f32 1.442695, %v1400_v22 }
  0x91   :  { %714 = vpow2.f32 %v488_v48  ;;  %v500_v26 = vmul.f32 1.442695, %v1403_v13  ;;  %v502_v37 = vmul.f32 1.442695, %v1406_v21  ;;  %v504_v53 = vmul.f32 1.442695, %v1409_v27 }
  0x92   :  { %716 = vpow2.f32 %v490_v45  ;;  %v506_v56 = vmul.f32 1.442695, %v1412_v35 }
  0x93   :  { %718 = vpow2.f32 %v492_v17 }
  0x94   :  { %720 = vpow2.f32 %v494_v4 }
  0x95   :  { %v703_v60 = vpop.eup %702  ;;  %722 = vpow2.f32 %v496_v10 }
  0x96   :  { %v705_v62 = vpop.eup %704  ;;  %724 = vpow2.f32 %v498_v30  ;;  %v508_v50 = vsub.f32 1.0, %v703_v60 }
  0x97   :  { %v707_v12 = vpop.eup %706  ;;  %726 = vpow2.f32 %v500_v26  ;;  %v509_v24 = vsub.f32 1.0, %v705_v62 }
  0x98   :  { %v709_v15 = vpop.eup %708  ;;  %728 = vpow2.f32 %v502_v37  ;;  %v510_v2 = vsub.f32 1.0, %v707_v12  ;;  %v524_v61 = vsub.f32 0.0, %v508_v50 }
  0x99   :  { %v711_v5 = vpop.eup %710  ;;  %730 = vpow2.f32 %v504_v53  ;;  %v511_v44 = vsub.f32 1.0, %v709_v15  ;;  %v525_v34 = vsub.f32 0.0, %v509_v24 }
  0x9a   :  { %v713_v20 = vpop.eup %712  ;;  %732 = vpow2.f32 %v506_v56  ;;  %v512_v32 = vsub.f32 1.0, %v711_v5  ;;  %v526_v23 = vsub.f32 0.0, %v510_v2  ;;  %v540_v8 = vmul.f32 %v524_v61, %v1363_v9 }
  0x9b   :  { %v715_v47 = vpop.eup %714  ;;  %v513_v18 = vsub.f32 1.0, %v713_v20  ;;  %v527_v42 = vsub.f32 0.0, %v511_v44  ;;  %v541_v11 = vmul.f32 %v525_v34, %v1365_v51 }
  0x9c   :  { %v717_v28 = vpop.eup %716  ;;  %v514_v16 = vsub.f32 1.0, %v715_v47  ;;  %v528_v0 = vsub.f32 0.0, %v512_v32  ;;  %v542_v25 = vmul.f32 %v526_v23, %v1367_v39 }
  0x9d   :  { %v719_v41 = vpop.eup %718  ;;  %v515_v31 = vsub.f32 1.0, %v717_v28  ;;  %v529_v59 = vsub.f32 0.0, %v513_v18  ;;  %v543_v3 = vmul.f32 %v527_v42, %v1369_v55 }
  0x9e   :  { %v721_v19 = vpop.eup %720  ;;  %v516_v14 = vsub.f32 1.0, %v719_v41  ;;  %v530_v57 = vsub.f32 0.0, %v514_v16  ;;  %v544_v9 = vmul.f32 %v528_v0, %v1375_v38  ;;  %v556_v7 = vadd.f32 %v542_v25, %v540_v8 }
  0x9f   :  { %v723_v49 = vpop.eup %722  ;;  %v517_v46 = vsub.f32 1.0, %v721_v19  ;;  %v531_v29 = vsub.f32 0.0, %v515_v31  ;;  %v545_v51 = vmul.f32 %v529_v59, %v1381_v63  ;;  %v557_v1 = vadd.f32 %v543_v3, %v541_v11 }
  0xa0   :  { %v725_v6 = vpop.eup %724  ;;  %v518_v36 = vsub.f32 1.0, %v723_v49  ;;  %v532_v39 = vsub.f32 0.0, %v516_v14  ;;  %v546_v48 = vmul.f32 %v530_v57, %v1383_v43  ;;  %v558_v52 = vadd.f32 %v556_v7, %v544_v9 }
  0xa1   :  { %v727_v45 = vpop.eup %726  ;;  %v519_v55 = vsub.f32 1.0, %v725_v6  ;;  %v533_v17 = vsub.f32 0.0, %v517_v46  ;;  %v547_v4 = vmul.f32 %v531_v29, %v1386_v40  ;;  %v559_v10 = vadd.f32 %v557_v1, %v545_v51 }
  0xa2   :  { %v729_v38 = vpop.eup %728  ;;  %v520_v30 = vsub.f32 1.0, %v727_v45  ;;  %v534_v26 = vsub.f32 0.0, %v518_v36  ;;  %v548_v37 = vmul.f32 %v532_v39, %v1391_v58  ;;  %v560_v60 = vadd.f32 %v558_v52, %v546_v48 }
  0xa3   :  { %v731_v63 = vpop.eup %730  ;;  %v521_v53 = vsub.f32 1.0, %v729_v38  ;;  %v535_v62 = vsub.f32 0.0, %v519_v55  ;;  %v549_v56 = vmul.f32 %v533_v17, %v1394_v54  ;;  %v561_v50 = vadd.f32 %v559_v10, %v547_v4 }
  0xa4   :  { %v733_v43 = vpop.eup %732  ;;  %v522_v12 = vsub.f32 1.0, %v731_v63  ;;  %v536_v24 = vsub.f32 0.0, %v520_v30  ;;  %v550_v15 = vmul.f32 %v534_v26, %v1397_v33  ;;  %v562_v2 = vadd.f32 %v560_v60, %v548_v37 }
  0xa5   :  { %v523_v40 = vsub.f32 1.0, %v733_v43  ;;  %v537_v61 = vsub.f32 0.0, %v521_v53  ;;  %v551_v5 = vmul.f32 %v535_v62, %v1400_v22  ;;  %v563_v44 = vadd.f32 %v561_v50, %v549_v56 }
  0xa6   :  { %v538_v34 = vsub.f32 0.0, %v522_v12  ;;  %v552_v58 = vmul.f32 %v536_v24, %v1403_v13  ;;  %v564_v20 = vadd.f32 %v562_v2, %v550_v15  ;;  %v810_v25 = vmov 1966171168  }
  0xa7   :  { %v539_v32 = vsub.f32 0.0, %v523_v40  ;;  %v553_v23 = vmul.f32 %v537_v61, %v1406_v21  ;;  %v565_v54 = vadd.f32 %v563_v44, %v551_v5  ;;  %v597_v41 = vunpack.c.l.s4 %v810_v25 }
  0xa8   :  { %v554_v8 = vmul.f32 %v538_v34, %v1409_v27  ;;  %v566_v47 = vadd.f32 %v564_v20, %v552_v58  ;;  %v599_v13 = vlaneseq }
  0xa9   :  { %v555_v18 = vmul.f32 %v539_v32, %v1412_v35  ;;  %v567_v33 = vadd.f32 %v565_v54, %v553_v23  ;;  %v598_v19 = vunpack.c.0.s8 %v597_v41 }
  0xaa   :  { %v568_v42 = vadd.f32 %v566_v47, %v554_v8  ;;  %v600_v14 = vshrl.u32 %v599_v13, 7  ;;  %vm613_vm0 = vcmp.lt.s32.totalorder %v599_v13, 256 }
  0xab   :  { %v569_v11 = vadd.f32 %v567_v33, %v555_v18 }
  0xac   :  { %v581_v28 = vrot.slane %v568_v42, 4  ;;  %v601_v7 = vsub.s32 %v598_v19, %v600_v14 }
  0xad   :  { %v587_v16 = vrot.slane %v569_v11, 4 }
  0xae   :  { %v582_v22 = vadd.f32 %v581_v28, %v568_v42 }
  0xaf   :  { %v588_v0 = vadd.f32 %v587_v16, %v569_v11 }
  0xb0   :  { %v583_v31 = vrot.slane %v582_v22, 2 }
  0xb1   :  { %v589_v59 = vrot.slane %v588_v0, 2 }
  0xb2   :  { %v584_v3 = vadd.f32 %v583_v31, %v582_v22 }
  0xb3   :  { %v590_v21 = vadd.f32 %v589_v59, %v588_v0 }
  0xb4   :  { %v585_v27 = vrot.slane %v584_v3, 1 }
  0xb5   :  { %v591_v57 = vrot.slane %v590_v21, 1 }
  0xb6   :  { %v586_v9 = vadd.f32 %v585_v27, %v584_v3 }
  0xb7   :  { %v592_v35 = vadd.f32 %v591_v57, %v590_v21 }
  0xb9   :  { %v595_v49 = vcombine.low %v586_v9, %v592_v35 }
  0xbb   :  { %v602_v46 = vrot.slane %v595_v49, %v601_v7 }
  0xbd   :  { %v609_v29 = vrot.slane %v602_v46, %v601_v7 }
  0xbf   :  { %615 = vst.msk [vmem:[#allocation8] sm:$0x3] %vm613_vm0, %v609_v29 }
  0xc0   :  { %789 = shalt.err (!%p786_p6)
}
  0xc1   :  { %s790_s10 = scalar_lea.hbm %s1449_s2, 32 }
  0xc2   :  { %p791_p7 = scmp.ne.s32.totalorder %s1449_s2, %s790_s10  ;;  %p794_p8 = scmp.lt.u32.totalorder %s790_s10, %s1449_s2 }
  0xc4   :  { %p796_p9 = pnand %p794_p8, %p791_p7 }
  0xc6   :  { %799 = shalt.err (!%p796_p9)
}
  0xc7   :  { %625 = dma.vmem_to_hbm [thread:$0]  %s623_s6, 32, %s1449_s2, [#allocation5]  }
  0xc8   :  { %804 = dma.done.wait [#allocation5], 32  }
  0xc9   :  { %805 = vsyncadd [#allocation5], 4294967264 }
  0xca   :  { %629 = vsyncpa [#allocation4], 1 }
  0xcb   :  { %630 = vsyncpa [#allocation7], 1 }
  0xcc   :  { %631 = vsyncpa [#allocation5], 1 }

</bundles_post_ra>
